<compile_context>
chip_gen: v7x
topology: tpu7x:2x2x1
jax: 0.10.0
libtpu: 0.0.40
codegen_flags: <defaults>
</compile_context>

<pallas_src>
import functools

import numpy as np
import jax
import jax.numpy as jnp
from jax.experimental import pallas as pl
from jax.experimental.pallas import tpu as pltpu

NUM_GAUSSIANS = 8
POSE_DIM = 69          # random_var_dim (SMPL body pose: 23 joints * 3)
D_PAD = 128            # 69 -> 128 lane padding (lane 127 = homogeneous 1)
MAX_TILE_B = 2048      # batch rows per grid step (multiple of 8)


def _round_up(x, m):
    return ((x + m - 1) // m) * m


def gmm_prior_kernel(pose_ref, rhs_ref, out_ref, pose_scr, *,
                     pose_dim, num_gaussians):
    """One fat MXU matmul + per-Gaussian lane reductions + running min.

    pose_ref : (TB, pose_dim)  raw pose tile (no wrapper-side padding)
    rhs_ref  : (128, M*128)    block m = 0.5*P_m (padded); its column 127
                               holds [-0.5*(P_m+P_m^T)mu_m ; ... ; c_m]
    out_ref  : (TB, 1)         min_m ll[b, m]
    pose_scr : (TB, 128)       VMEM scratch for the homogeneous padded pose
    """
    tb = pose_scr.shape[0]

    # Build the homogeneous padded pose tile entirely in VMEM (no HBM round
    # trip): lanes 0..pose_dim-1 = pose, pose_dim..126 = 0, lane 127 = 1.
    # Re-initialised every grid step, so it is safe when the "parallel" grid
    # axis is split across TensorCores (scratch is per-core, never carried).
    lane = jax.lax.broadcasted_iota(jnp.int32, (tb, D_PAD), 1)
    pose_scr[...] = (lane == D_PAD - 1).astype(jnp.float32)
    pose_scr[:, :pose_dim] = pose_ref[...]          # masked partial-lane store
    pose = pose_scr[...]                            # (TB, 128)

    # Single fat matmul against the resident GMM operand.
    pp = jnp.dot(pose, rhs_ref[...],
                 preferred_element_type=jnp.float32)        # (TB, M*128)

    # ll[b, m] = sum_lanes(pp_block_m * pose): quadratic + linear + const (the
    # latter two ride on lane 127 where pose == 1). Static 128-aligned lane
    # slices -> no relayout; running minimum -> no concatenate.
    # TODO(synk): profile-gated alternative from the review (pp * tiled pose,
    # then one matmul against a block-indicator + lane min) trades XLU
    # reductions for MXU pushes if the extended slot saturates at huge batch.
    ll_min = jnp.sum(pp[:, 0:D_PAD] * pose, axis=-1, keepdims=True)
    for m in range(1, num_gaussians):
        ll = jnp.sum(pp[:, m * D_PAD:(m + 1) * D_PAD] * pose,
                     axis=-1, keepdims=True)
        ll_min = jnp.minimum(ll_min, ll)
    out_ref[...] = ll_min                                   # (TB, 1)


def _build_rhs(means, precisions, nll_weights):
    """Fold 0.5*P, the linear term and the per-Gaussian constant into a single
    (D_PAD, M*D_PAD) matmul operand. Runs once in plain XLA (not the kernel)."""
    M, D = means.shape
    prec = precisions.astype(jnp.float32)
    mu = means.astype(jnp.float32)
    w = nll_weights.reshape(-1).astype(jnp.float32)   # must be > 0 (true for GMM)

    # linear coefficient:  -0.5 * (P + P^T) @ mu   (exact, no symmetry assumed)
    lin = -0.5 * jnp.einsum('mij,mj->mi', prec + jnp.swapaxes(prec, 1, 2), mu)
    # per-Gaussian constant:  0.5 * mu^T P mu - log(nll_w)
    const = 0.5 * jnp.einsum('mj,mij,mi->m', mu, prec, mu) - jnp.log(w)

    rhs_blocks = jnp.zeros((M, D_PAD, D_PAD), jnp.float32)
    rhs_blocks = rhs_blocks.at[:, :D, :D].set(0.5 * prec)
    lincol = (jnp.zeros((M, D_PAD), jnp.float32)
              .at[:, :D].set(lin)
              .at[:, D_PAD - 1].set(const))
    rhs_blocks = rhs_blocks.at[:, :, D_PAD - 1].set(lincol)
    # (M, Dp, Dp) -> (Dp, M*Dp): columns m*128:(m+1)*128 belong to Gaussian m.
    return jnp.transpose(rhs_blocks, (1, 0, 2)).reshape(D_PAD, M * D_PAD)


def _select_tile_b(batch):
    """Batch rows per grid step: as large as VMEM allows, but >= 2 grid steps
    when the batch permits (v7x has two TensorCores on the "parallel" axis)."""
    b8 = _round_up(batch, 8)
    if b8 <= 16:
        return b8
    n_tiles = max(2, pl.cdiv(b8, MAX_TILE_B))
    return min(MAX_TILE_B, _round_up(pl.cdiv(b8, n_tiles), 8))


def max_mixture_prior_forward(pose, betas, means, precisions, nll_weights):
    """Forward pass of MaxMixturePrior (use_merged=True). `betas` is unused,
    matching the PyTorch merged_log_likelihood signature."""
    del betas
    B, D = pose.shape
    M = means.shape[0]
    assert D < D_PAD, "pose dim must leave a free homogeneous lane"

    tile_b = _select_tile_b(B)
    grid_len = pl.cdiv(B, tile_b)   # partial final block handled by Pallas

    rhs = _build_rhs(means, precisions, nll_weights)      # (128, M*128), once

    kernel = functools.partial(gmm_prior_kernel, pose_dim=D, num_gaussians=M)

    out = pl.pallas_call(
        kernel,
        out_shape=jax.ShapeDtypeStruct((B, 1), jnp.float32),
        grid=(grid_len,),
        in_specs=[
            # Raw (un-padded) pose tile: last dim equals the full array dim,
            # so the (8,128) block rule is satisfied and no padded pose copy
            # is ever written to / re-read from HBM by the wrapper.
            pl.BlockSpec((tile_b, D), lambda i: (i, 0)),
            # GMM operand: constant index_map -> stays resident in VMEM.
            # (pl.Buffered(1) would drop the redundant 512 KiB second buffer;
            #  skipped since VMEM headroom is ample at TB <= 2048.)
            pl.BlockSpec((D_PAD, M * D_PAD), lambda i: (0, 0)),
        ],
        # (tile_b, 1) output writeback is noise vs. the matmul/reductions;
        # lane-dense output only worth revisiting at extreme batch sizes.
        out_specs=pl.BlockSpec((tile_b, 1), lambda i: (i, 0)),
        scratch_shapes=[pltpu.VMEM((tile_b, D_PAD), jnp.float32)],
        compiler_params=pltpu.CompilerParams(
            dimension_semantics=("parallel",)),           # 2-TC sharding on v7x
    )(pose.astype(jnp.float32), rhs)
    return out[:, 0]                                      # (B,)


def build_synthetic_gmm_params(key):
    """Deterministic synthetic stand-in for the gmm_08.pkl buffers."""
    k_means, k_cov, k_w = jax.random.split(key, 3)
    M, D = NUM_GAUSSIANS, POSE_DIM

    means = 0.1 * jax.random.normal(k_means, (M, D), jnp.float32)

    # SPD covariances -> precisions (numpy float64 for inv/det, as in __init__).
    A = np.asarray(jax.random.normal(k_cov, (M, D, D), jnp.float32), dtype=np.float64)
    covs = A @ np.transpose(A, (0, 2, 1)) / D + 0.5 * np.eye(D)[None]
    precisions = np.stack([np.linalg.inv(c) for c in covs]).astype(np.float32)

    w_raw = np.asarray(jax.random.uniform(k_w, (M,), jnp.float32), dtype=np.float64) + 0.1
    weights = w_raw / w_raw.sum()
    sqrdets = np.array([np.sqrt(np.linalg.det(c)) for c in covs])
    const = (2 * np.pi) ** (D / 2.0)
    nll_weights = (weights / (const * (sqrdets / sqrdets.min())))[None, :].astype(np.float32)

    return (jnp.asarray(means, jnp.float32),
            jnp.asarray(precisions, jnp.float32),
            jnp.asarray(nll_weights, jnp.float32))


def reference_forward(pose, means, precisions, nll_weights):
    diff = pose[:, None, :] - means[None, :, :]
    pd = jnp.einsum('mij,bmj->bmi', precisions, diff)
    quad = jnp.sum(pd * diff, axis=-1)
    ll = 0.5 * quad - jnp.log(nll_weights)
    return jnp.min(ll, axis=1)


if __name__ == "__main__":
    key = jax.random.PRNGKey(0)
    k_params, k_pose, k_betas = jax.random.split(key, 3)

    B = 2
    means, precisions, nll_weights = build_synthetic_gmm_params(k_params)
    pose = 0.2 * jax.random.normal(k_pose, (B, POSE_DIM), jnp.float32)
    betas = jax.random.normal(k_betas, (B, 10), jnp.float32)  # unused by merged path

    out = max_mixture_prior_forward(pose, betas, means, precisions, nll_weights)
    out = jax.block_until_ready(out)

    ref = jax.block_until_ready(reference_forward(pose, means, precisions, nll_weights))
    assert out.shape == (B,)
    # f32 MXU math + algebraic expansion: slightly looser (still tight) tol.
    np.testing.assert_allclose(np.asarray(out), np.asarray(ref), rtol=5e-4, atol=1e-3)

    print("KERNEL_OK")
</pallas_src>

<mosaic_0001>
module attributes {stable_mosaic.version = 11 : i64} {
  func.func @gmm_prior_kernel(%arg0: i32, %arg1: memref<8x69xf32, #tpu.memory_space<vmem>>, %arg2: memref<128x1024xf32, #tpu.memory_space<vmem>>, %arg3: memref<8x1xf32, #tpu.memory_space<vmem>>, %arg4: memref<8x128xf32, #tpu.memory_space<vmem>>) attributes {dimension_semantics = [#tpu.dimension_semantics<parallel>], iteration_bounds = array<i64: 1>, scalar_prefetch = 0 : i64, scratch_operands = 1 : i64, tpu.core_type = #tpu.core_type<tc>, window_params = [{transform_indices = @transform_0, window_bounds = array<i64: 8, 69>}, {pipeline_mode = #tpu.pipeline_mode<synchronous>, transform_indices = @transform_1, window_bounds = array<i64: 128, 1024>}, {transform_indices = @transform_2, window_bounds = array<i64: 8, 1>}]} {
    %0 = tpu.iota {dimensions = array<i32: 1>} : vector<8x128xi32>
    %c127_i32 = arith.constant 127 : i32
    %1 = vector.broadcast %c127_i32 : i32 to vector<8x128xi32>
    %2 = arith.cmpi eq, %0, %1 : vector<8x128xi32>
    %3 = arith.extui %2 : vector<8x128xi1> to vector<8x128xi32>
    %4 = arith.sitofp %3 : vector<8x128xi32> to vector<8x128xf32>
    %c0 = arith.constant 0 : index
    %c0_0 = arith.constant 0 : index
    %5 = vector.load %arg4[%c0, %c0_0] : memref<8x128xf32, #tpu.memory_space<vmem>>, vector<8x128xf32>
    tpu.vector_store %arg4[%c0, %c0_0], %4 {strides = array<i32>} : memref<8x128xf32, #tpu.memory_space<vmem>>, vector<8x128xf32>,
    %c0_1 = arith.constant 0 : index
    %c0_2 = arith.constant 0 : index
    %6 = vector.load %arg1[%c0_1, %c0_2] : memref<8x69xf32, #tpu.memory_space<vmem>>, vector<8x69xf32>
    %c0_3 = arith.constant 0 : index
    %c0_4 = arith.constant 0 : index
    %7 = vector.load %arg4[%c0_3, %c0_4] : memref<8x128xf32, #tpu.memory_space<vmem>>, vector<8x69xf32>
    tpu.vector_store %arg4[%c0_3, %c0_4], %6 {strides = array<i32>} : memref<8x128xf32, #tpu.memory_space<vmem>>, vector<8x69xf32>,
    %c0_5 = arith.constant 0 : index
    %c0_6 = arith.constant 0 : index
    %8 = vector.load %arg4[%c0_5, %c0_6] : memref<8x128xf32, #tpu.memory_space<vmem>>, vector<8x128xf32>
    %c0_7 = arith.constant 0 : index
    %c0_8 = arith.constant 0 : index
    %9 = vector.load %arg2[%c0_7, %c0_8] : memref<128x1024xf32, #tpu.memory_space<vmem>>, vector<128x1024xf32>
    %cst = arith.constant dense<0.000000e+00> : vector<8x1024xf32>
    %10 = tpu.matmul %8, %9, %cst {dimension_numbers = #tpu.dot_dimension_numbers<[1], [0], [0], [1], [0, 0, 1, 1], [], []>} : vector<8x128xf32>, vector<128x1024xf32>, vector<8x1024xf32> -> vector<8x1024xf32>
    %11 = vector.extract_strided_slice %10 {offsets = [0, 0], sizes = [8, 128], strides = [1, 1]} : vector<8x1024xf32> to vector<8x128xf32>
    %12 = arith.mulf %11, %8 : vector<8x128xf32>
    %cst_9 = arith.constant dense<0.000000e+00> : vector<8xf32>
    %13 = vector.multi_reduction <add>, %12, %cst_9 [1] : vector<8x128xf32> to vector<8xf32>
    %14 = vector.shape_cast %13 : vector<8xf32> to vector<8x1xf32>
    %15 = vector.extract_strided_slice %10 {offsets = [0, 128], sizes = [8, 128], strides = [1, 1]} : vector<8x1024xf32> to vector<8x128xf32>
    %16 = arith.mulf %15, %8 : vector<8x128xf32>
    %cst_10 = arith.constant dense<0.000000e+00> : vector<8xf32>
    %17 = vector.multi_reduction <add>, %16, %cst_10 [1] : vector<8x128xf32> to vector<8xf32>
    %18 = vector.shape_cast %17 : vector<8xf32> to vector<8x1xf32>
    %19 = arith.minimumf %14, %18 : vector<8x1xf32>
    %20 = vector.extract_strided_slice %10 {offsets = [0, 256], sizes = [8, 128], strides = [1, 1]} : vector<8x1024xf32> to vector<8x128xf32>
    %21 = arith.mulf %20, %8 : vector<8x128xf32>
    %cst_11 = arith.constant dense<0.000000e+00> : vector<8xf32>
    %22 = vector.multi_reduction <add>, %21, %cst_11 [1] : vector<8x128xf32> to vector<8xf32>
    %23 = vector.shape_cast %22 : vector<8xf32> to vector<8x1xf32>
    %24 = arith.minimumf %19, %23 : vector<8x1xf32>
    %25 = vector.extract_strided_slice %10 {offsets = [0, 384], sizes = [8, 128], strides = [1, 1]} : vector<8x1024xf32> to vector<8x128xf32>
    %26 = arith.mulf %25, %8 : vector<8x128xf32>
    %cst_12 = arith.constant dense<0.000000e+00> : vector<8xf32>
    %27 = vector.multi_reduction <add>, %26, %cst_12 [1] : vector<8x128xf32> to vector<8xf32>
    %28 = vector.shape_cast %27 : vector<8xf32> to vector<8x1xf32>
    %29 = arith.minimumf %24, %28 : vector<8x1xf32>
    %30 = vector.extract_strided_slice %10 {offsets = [0, 512], sizes = [8, 128], strides = [1, 1]} : vector<8x1024xf32> to vector<8x128xf32>
    %31 = arith.mulf %30, %8 : vector<8x128xf32>
    %cst_13 = arith.constant dense<0.000000e+00> : vector<8xf32>
    %32 = vector.multi_reduction <add>, %31, %cst_13 [1] : vector<8x128xf32> to vector<8xf32>
    %33 = vector.shape_cast %32 : vector<8xf32> to vector<8x1xf32>
    %34 = arith.minimumf %29, %33 : vector<8x1xf32>
    %35 = vector.extract_strided_slice %10 {offsets = [0, 640], sizes = [8, 128], strides = [1, 1]} : vector<8x1024xf32> to vector<8x128xf32>
    %36 = arith.mulf %35, %8 : vector<8x128xf32>
    %cst_14 = arith.constant dense<0.000000e+00> : vector<8xf32>
    %37 = vector.multi_reduction <add>, %36, %cst_14 [1] : vector<8x128xf32> to vector<8xf32>
    %38 = vector.shape_cast %37 : vector<8xf32> to vector<8x1xf32>
    %39 = arith.minimumf %34, %38 : vector<8x1xf32>
    %40 = vector.extract_strided_slice %10 {offsets = [0, 768], sizes = [8, 128], strides = [1, 1]} : vector<8x1024xf32> to vector<8x128xf32>
    %41 = arith.mulf %40, %8 : vector<8x128xf32>
    %cst_15 = arith.constant dense<0.000000e+00> : vector<8xf32>
    %42 = vector.multi_reduction <add>, %41, %cst_15 [1] : vector<8x128xf32> to vector<8xf32>
    %43 = vector.shape_cast %42 : vector<8xf32> to vector<8x1xf32>
    %44 = arith.minimumf %39, %43 : vector<8x1xf32>
    %45 = vector.extract_strided_slice %10 {offsets = [0, 896], sizes = [8, 128], strides = [1, 1]} : vector<8x1024xf32> to vector<8x128xf32>
    %46 = arith.mulf %45, %8 : vector<8x128xf32>
    %cst_16 = arith.constant dense<0.000000e+00> : vector<8xf32>
    %47 = vector.multi_reduction <add>, %46, %cst_16 [1] : vector<8x128xf32> to vector<8xf32>
    %48 = vector.shape_cast %47 : vector<8xf32> to vector<8x1xf32>
    %49 = arith.minimumf %44, %48 : vector<8x1xf32>
    %c0_17 = arith.constant 0 : index
    %c0_18 = arith.constant 0 : index
    %50 = vector.load %arg3[%c0_17, %c0_18] : memref<8x1xf32, #tpu.memory_space<vmem>>, vector<8x1xf32>
    tpu.vector_store %arg3[%c0_17, %c0_18], %49 {strides = array<i32>} : memref<8x1xf32, #tpu.memory_space<vmem>>, vector<8x1xf32>,
    return
  }
  func.func @transform_0(%arg0: i32) -> (i32, i32) {
    %c0_i32 = arith.constant 0 : i32
    %c0_i32_0 = arith.constant 0 : i32
    return %arg0, %c0_i32 : i32, i32
  }
  func.func @transform_1(%arg0: i32) -> (i32, i32) {
    %c0_i32 = arith.constant 0 : i32
    %c0_i32_0 = arith.constant 0 : i32
    %c0_i32_1 = arith.constant 0 : i32
    return %c0_i32, %c0_i32_0 : i32, i32
  }
  func.func @transform_2(%arg0: i32) -> (i32, i32) {
    %c0_i32 = arith.constant 0 : i32
    %c0_i32_0 = arith.constant 0 : i32
    return %arg0, %c0_i32 : i32, i32
  }
}

</mosaic_0001>

<bundles_post_ra>
// kernel: tpu_custom_call.1
= control target key start
LH: loop header
LB: loop body
LE: loop exit
PB: predicated region body
PF: predicated region fallthrough
CT: control target
= control target key end

     0   :  { %7 = vsyncpa [#allocation4], 0  ;;  %s788_s0 = inlined_call_operand.hbm [shape: f32[2,69], index: 0, kind: input, shape index: {}]   ;;  %s789_s1 = inlined_call_operand.hbm [shape: f32[128,1024], index: 1, kind: input, shape index: {}]   ;;  %s790_s2 = inlined_call_operand.vmem [shape: f32[2,1], index: 2, kind: output, shape index: {}]  }
   0x1   :  { %8 = vsyncpa [#allocation6], 0 }
   0x2   :  { %13 = vsyncadd [#allocation4], 96  ;;  %s719_s9 = smov [#allocation3]   ;;  %s671_s13 = scalar_lea.hbm %s788_s0, 32 }
   0x3   :  { %s14_s10 = sshll.u32 %s719_s9, 4  ;;  %p672_p0 = scmp.ne.s32.totalorder %s788_s0, %s671_s13  ;;  %s15_s10 = int_to_ptr.vmem [resolvable:$true] %s14_s10 }
   0x4   :  { %p675_p1 = scmp.lt.u32.totalorder %s671_s13, %s788_s0 }
   0x6   :  { %p677_p2 = pnand %p675_p1, %p672_p0 }
   0x8   :  { %680 = shalt.err (!%p677_p2)
}
   0x9   :  { %s681_s18 = scalar_lea.vmem %s15_s10, 32  ;;  %s685_s19 = scalar_lea.vmem %s15_s10, 128 }
   0xa   :  { %p682_p3 = scmp.ne.s32.totalorder %s15_s10, %s681_s18  ;;  %p686_p4 = scmp.lt.s32.totalorder %s15_s10, %s15_s10 }
   0xb   :  { %p687_p5 = scmp.lt.s32.totalorder %s685_s19, %s681_s18 }
   0xd   :  { %p688_p6 = por %p687_p5, %p686_p4 }
   0xf   :  { %p689_p7 = pnand %p688_p6, %p682_p3 }
  0x11   :  { %692 = shalt.err (!%p689_p7)
}
  0x12   :  { %s720_s20 = smov 32   ;;  %s721_s21 = smov 2  }
  0x13   :  { %20 = dma.hbm_to_vmem [thread:$0]  %s788_s0, 32, %s15_s10, [#allocation4], %s720_s20, %s720_s20, %s721_s21  }
  0x14   :  { %s722_s24 = smov [#allocation5]   ;;  %s693_s28 = scalar_lea.hbm %s789_s1, 16384 }
  0x15   :  { %s26_s25 = sshll.u32 %s722_s24, 4  ;;  %p694_p8 = scmp.ne.s32.totalorder %s789_s1, %s693_s28  ;;  %s27_s25 = int_to_ptr.vmem [resolvable:$true] %s26_s25 }
  0x16   :  { %p697_p9 = scmp.lt.u32.totalorder %s693_s28, %s789_s1 }
  0x18   :  { %p699_p10 = pnand %p697_p9, %p694_p8 }
  0x1a   :  { %702 = shalt.err (!%p699_p10)
}
  0x1b   :  { %s703_s5 = scalar_lea.vmem %s27_s25, 16384  ;;  %p708_p12 = scmp.lt.s32.totalorder %s27_s25, %s27_s25 }
  0x1c   :  { %p704_p11 = scmp.ne.s32.totalorder %s27_s25, %s703_s5  ;;  %p709_p13 = scmp.lt.s32.totalorder %s703_s5, %s703_s5 }
  0x1e   :  { %p710_p0 = por %p709_p13, %p708_p12 }
  0x20   :  { %p711_p1 = pnand %p710_p0, %p704_p11 }
  0x22   :  { %714 = shalt.err (!%p711_p1)
}
  0x23   :  { %s723_s0 = smov 1024   ;;  %s724_s6 = smov 64  }
  0x24   :  { %32 = dma.hbm_to_vmem [thread:$0]  %s789_s1, 16384, %s27_s25, [#allocation6], %s723_s0, %s723_s0, %s724_s6  }
  0x25   :  { %715 = dma.done.wait [#allocation4], 128  }
  0x26   :  { %716 = vsyncadd [#allocation4], 4294967168 }
  0x27   :  { %717 = dma.done.wait [#allocation6], 16384  }
  0x28   :  { %718 = vsyncadd [#allocation6], 4294950912  ;;  %v39_v0 = vlaneseq  ;;  %v725_v1 = vmov 0.0   ;;  %v50_v4 = vld [vmem:[#allocation5 + $0x8] sm:$0xff]  ;;  %v49_v6 = vld [vmem:[#allocation5] sm:$0xff]  ;;  %vm46_vm1 = vcmask 564224  }
  0x29   :  { %241 = vmatprep.mubr.f32.mxu0 %v725_v1  ;;  %312 = vmatprep.mubr.f32.mxu1 %v725_v1  ;;  %v58_v5 = vld [vmem:[#allocation5 + $0x48] sm:$0xff]  ;;  %v57_v8 = vld [vmem:[#allocation5 + $0x40] sm:$0xff]  ;;  %v52_v9 = vld [vmem:[#allocation5 + $0x18] sm:$0xff]  ;;  %vm492_vm2 = vcmask 7168  }
  0x2a   :  { %v40_v2 = vand.u32 127, %v39_v0  ;;  %v536_v7 = vpack.c.bf16 %v58_v5, %v50_v4  ;;  %v60_v10 = vld [vmem:[#allocation5 + $0x58] sm:$0xff]  ;;  %v538_v11 = vpack.c.bf16 %v57_v8, %v49_v6  ;;  %v51_v13 = vld [vmem:[#allocation5 + $0x10] sm:$0xff]  ;;  %v66_v15 = vld [vmem:[#allocation5 + $0x88] sm:$0xff] }
  0x2b   :  { %v568_v12 = vpack.c.bf16 %v60_v10, %v52_v9  ;;  %v59_v14 = vld [vmem:[#allocation5 + $0x50] sm:$0xff]  ;;  %v74_v17 = vld [vmem:[#allocation5 + $0xc8] sm:$0xff]  ;;  %v65_v18 = vld [vmem:[#allocation5 + $0x80] sm:$0xff] }
  0x2c   :  { %vm41_vm0 = vcmp.eq.s32.totalorder %v40_v2, 127  ;;  %537 = vmatprep.subr.bf16.mxu0 %v536_v7  ;;  %v570_v16 = vpack.c.bf16 %v59_v14, %v51_v13  ;;  %v73_v19 = vld [vmem:[#allocation5 + $0xc0] sm:$0xff]  ;;  %v540_v20 = vpack.c.bf16 %v74_v17, %v66_v15  ;;  %v68_v22 = vld [vmem:[#allocation5 + $0x98] sm:$0xff]  ;;  %v67_v24 = vld [vmem:[#allocation5 + $0x90] sm:$0xff] }
  0x2d   :  { %v535_v3 = vsel %vm41_vm0, 1.0, %v725_v1  ;;  %539 = vmatpush1.bf16.msra.mxu0 %v538_v11  ;;  %569 = vmatprep.subr.bf16.mxu1 %v568_v12  ;;  %v542_v21 = vpack.c.bf16 %v73_v19, %v65_v18  ;;  %v76_v23 = vld [vmem:[#allocation5 + $0xd8] sm:$0xff]  ;;  %v75_v26 = vld [vmem:[#allocation5 + $0xd0] sm:$0xff]  ;;  %v82_v27 = vld [vmem:[#allocation5 + $0x108] sm:$0xff] }
  0x2e   :  { %44 = vst [vmem:[#allocation2] sm:$0xff] %v535_v3  ;;  %571 = vmatpush1.bf16.msra.mxu1 %v570_v16  ;;  %v572_v25 = vpack.c.bf16 %v76_v23, %v68_v22  ;;  %v90_v28 = vld [vmem:[#allocation5 + $0x148] sm:$0xff]  ;;  %541 = vmatprep.subr.bf16.mxu0 %v540_v20  ;;  %v574_v29 = vpack.c.bf16 %v75_v26, %v67_v24  ;;  %v81_v31 = vld [vmem:[#allocation5 + $0x100] sm:$0xff]  ;;  %v84_v33 = vld [vmem:[#allocation5 + $0x118] sm:$0xff] }
  0x2f   :  { %v544_v30 = vpack.c.bf16 %v90_v28, %v82_v27  ;;  %v89_v32 = vld [vmem:[#allocation5 + $0x140] sm:$0xff]  ;;  %v92_v34 = vld [vmem:[#allocation5 + $0x158] sm:$0xff]  ;;  %v83_v35 = vld [vmem:[#allocation5 + $0x110] sm:$0xff] }
  0x30   :  { %573 = vmatprep.subr.bf16.mxu1 %v572_v25  ;;  %v91_v36 = vld [vmem:[#allocation5 + $0x150] sm:$0xff]  ;;  %v546_v37 = vpack.c.bf16 %v89_v32, %v81_v31  ;;  %v576_v38 = vpack.c.bf16 %v92_v34, %v84_v33  ;;  %v98_v39 = vld [vmem:[#allocation5 + $0x188] sm:$0xff]  ;;  %v97_v41 = vld [vmem:[#allocation5 + $0x180] sm:$0xff] }
  0x31   :  { %543 = vmatpush1.bf16.msra.mxu0 %v542_v21  ;;  %v106_v40 = vld [vmem:[#allocation5 + $0x1c8] sm:$0xff]  ;;  %v578_v42 = vpack.c.bf16 %v91_v36, %v83_v35  ;;  %v105_v44 = vld [vmem:[#allocation5 + $0x1c0] sm:$0xff]  ;;  %v100_v45 = vld [vmem:[#allocation5 + $0x198] sm:$0xff] }
  0x32   :  { %575 = vmatpush1.bf16.msra.mxu1 %v574_v29  ;;  %545 = vmatprep.subr.bf16.mxu0 %v544_v30  ;;  %v548_v43 = vpack.c.bf16 %v106_v40, %v98_v39  ;;  %v108_v46 = vld [vmem:[#allocation5 + $0x1d8] sm:$0xff]  ;;  %v99_v48 = vld [vmem:[#allocation5 + $0x190] sm:$0xff]  ;;  %v114_v50 = vld [vmem:[#allocation5 + $0x208] sm:$0xff]  ;;  %v550_v52 = vpack.c.bf16 %v105_v44, %v97_v41 }
  0x33   :  { %577 = vmatprep.subr.bf16.mxu1 %v576_v38  ;;  %v580_v47 = vpack.c.bf16 %v108_v46, %v100_v45  ;;  %v107_v49 = vld [vmem:[#allocation5 + $0x1d0] sm:$0xff]  ;;  %v122_v51 = vld [vmem:[#allocation5 + $0x248] sm:$0xff]  ;;  %v116_v53 = vld [vmem:[#allocation5 + $0x218] sm:$0xff] }
  0x34   :  { %v124_v54 = vld [vmem:[#allocation5 + $0x258] sm:$0xff]  ;;  %v582_v55 = vpack.c.bf16 %v107_v49, %v99_v48  ;;  %v552_v56 = vpack.c.bf16 %v122_v51, %v114_v50  ;;  %v113_v57 = vld [vmem:[#allocation5 + $0x200] sm:$0xff]  ;;  %v115_v59 = vld [vmem:[#allocation5 + $0x210] sm:$0xff] }
  0x35   :  { %547 = vmatpush1.bf16.msra.mxu0 %v546_v37  ;;  %v121_v58 = vld [vmem:[#allocation5 + $0x240] sm:$0xff]  ;;  %v584_v60 = vpack.c.bf16 %v124_v54, %v116_v53  ;;  %v123_v61 = vld [vmem:[#allocation5 + $0x250] sm:$0xff]  ;;  %v130_v62 = vld [vmem:[#allocation5 + $0x288] sm:$0xff] }
  0x36   :  { %579 = vmatpush1.bf16.msra.mxu1 %v578_v42  ;;  %549 = vmatprep.subr.bf16.mxu0 %v548_v43  ;;  %v138_v63 = vld [vmem:[#allocation5 + $0x2c8] sm:$0xff]  ;;  %v132_v0 = vld [vmem:[#allocation5 + $0x298] sm:$0xff]  ;;  %v554_v3 = vpack.c.bf16 %v121_v58, %v113_v57  ;;  %v586_v4 = vpack.c.bf16 %v123_v61, %v115_v59  ;;  %v129_v6 = vld [vmem:[#allocation5 + $0x280] sm:$0xff] }
  0x37   :  { %581 = vmatprep.subr.bf16.mxu1 %v580_v47  ;;  %v140_v2 = vld [vmem:[#allocation5 + $0x2d8] sm:$0xff]  ;;  %v556_v5 = vpack.c.bf16 %v138_v63, %v130_v62  ;;  %v137_v7 = vld [vmem:[#allocation5 + $0x2c0] sm:$0xff]  ;;  %v131_v8 = vld [vmem:[#allocation5 + $0x290] sm:$0xff] }
  0x38   :  { %v588_v9 = vpack.c.bf16 %v140_v2, %v132_v0  ;;  %v139_v10 = vld [vmem:[#allocation5 + $0x2d0] sm:$0xff]  ;;  %v146_v11 = vld [vmem:[#allocation5 + $0x308] sm:$0xff]  ;;  %v148_v13 = vld [vmem:[#allocation5 + $0x318] sm:$0xff]  ;;  %v558_v15 = vpack.c.bf16 %v137_v7, %v129_v6 }
  0x39   :  { %551 = vmatpush1.bf16.msra.mxu0 %v550_v52  ;;  %v154_v12 = vld [vmem:[#allocation5 + $0x348] sm:$0xff]  ;;  %v156_v14 = vld [vmem:[#allocation5 + $0x358] sm:$0xff]  ;;  %v145_v16 = vld [vmem:[#allocation5 + $0x300] sm:$0xff]  ;;  %v590_v17 = vpack.c.bf16 %v139_v10, %v131_v8 }
  0x3a   :  { %583 = vmatpush1.bf16.msra.mxu1 %v582_v55  ;;  %553 = vmatprep.subr.bf16.mxu0 %v552_v56  ;;  %v560_v18 = vpack.c.bf16 %v154_v12, %v146_v11  ;;  %v153_v19 = vld [vmem:[#allocation5 + $0x340] sm:$0xff]  ;;  %v147_v20 = vld [vmem:[#allocation5 + $0x310] sm:$0xff]  ;;  %v45_v21 = vld [vmem:[#allocation3] sm:$0xff]  ;;  %v592_v22 = vpack.c.bf16 %v156_v14, %v148_v13 }
  0x3b   :  { %585 = vmatprep.subr.bf16.mxu1 %v584_v60  ;;  %v155_v23 = vld [vmem:[#allocation5 + $0x350] sm:$0xff]  ;;  %v162_v24 = vld [vmem:[#allocation5 + $0x388] sm:$0xff]  ;;  %47 = vst.msk [vmem:[#allocation2] sm:$0xff] %vm46_vm1, %v45_v21  ;;  %v164_v26 = vld [vmem:[#allocation5 + $0x398] sm:$0xff]  ;;  %v562_v28 = vpack.c.bf16 %v153_v19, %v145_v16 }
  0x3c   :  { %v170_v25 = vld [vmem:[#allocation5 + $0x3c8] sm:$0xff]  ;;  %v172_v27 = vld [vmem:[#allocation5 + $0x3d8] sm:$0xff]  ;;  %v594_v29 = vpack.c.bf16 %v155_v23, %v147_v20  ;;  %v161_v31 = vld [vmem:[#allocation5 + $0x380] sm:$0xff] }
  0x3d   :  { %555 = vmatpush1.bf16.msra.mxu0 %v554_v3  ;;  %v564_v30 = vpack.c.bf16 %v170_v25, %v162_v24  ;;  %v169_v32 = vld [vmem:[#allocation5 + $0x3c0] sm:$0xff]  ;;  %v163_v33 = vld [vmem:[#allocation5 + $0x390] sm:$0xff]  ;;  %v596_v34 = vpack.c.bf16 %v172_v27, %v164_v26  ;;  %v54_v36 = vld [vmem:[#allocation5 + $0x28] sm:$0xff] }
  0x3e   :  { %587 = vmatpush1.bf16.msra.mxu1 %v586_v4  ;;  %557 = vmatprep.subr.bf16.mxu0 %v556_v5  ;;  %v171_v35 = vld [vmem:[#allocation5 + $0x3d0] sm:$0xff]  ;;  %v62_v37 = vld [vmem:[#allocation5 + $0x68] sm:$0xff]  ;;  %v56_v38 = vld [vmem:[#allocation5 + $0x38] sm:$0xff]  ;;  %v566_v40 = vpack.c.bf16 %v169_v32, %v161_v31 }
  0x3f   :  { %589 = vmatprep.subr.bf16.mxu1 %v588_v9  ;;  %v64_v39 = vld [vmem:[#allocation5 + $0x78] sm:$0xff]  ;;  %v598_v41 = vpack.c.bf16 %v171_v35, %v163_v33  ;;  %v600_v42 = vpack.c.bf16 %v62_v37, %v54_v36  ;;  %v53_v43 = vld [vmem:[#allocation5 + $0x20] sm:$0xff]  ;;  %v70_v45 = vld [vmem:[#allocation5 + $0xa8] sm:$0xff] }
  0x40   :  { %v61_v44 = vld [vmem:[#allocation5 + $0x60] sm:$0xff]  ;;  %v632_v46 = vpack.c.bf16 %v64_v39, %v56_v38  ;;  %v78_v47 = vld [vmem:[#allocation5 + $0xe8] sm:$0xff]  ;;  %v55_v48 = vld [vmem:[#allocation5 + $0x30] sm:$0xff] }
  0x41   :  { %559 = vmatpush1.bf16.msra.mxu0 %v558_v15  ;;  %v63_v49 = vld [vmem:[#allocation5 + $0x70] sm:$0xff]  ;;  %v72_v50 = vld [vmem:[#allocation5 + $0xb8] sm:$0xff]  ;;  %v602_v53 = vpack.c.bf16 %v61_v44, %v53_v43  ;;  %v604_v54 = vpack.c.bf16 %v78_v47, %v70_v45  ;;  %v69_v56 = vld [vmem:[#allocation5 + $0xa0] sm:$0xff] }
  0x42   :  { %591 = vmatpush1.bf16.msra.mxu1 %v590_v17  ;;  %561 = vmatprep.subr.bf16.mxu0 %v560_v18  ;;  %v80_v51 = vld [vmem:[#allocation5 + $0xf8] sm:$0xff]  ;;  %v769_v52 = vld [vmem:[#allocation2] sm:$0xff]  ;;  %v634_v55 = vpack.c.bf16 %v63_v49, %v55_v48  ;;  %v77_v57 = vld [vmem:[#allocation5 + $0xe0] sm:$0xff] }
  0x43   :  { %593 = vmatprep.subr.bf16.mxu1 %v592_v22  ;;  %v86_v58 = vld [vmem:[#allocation5 + $0x128] sm:$0xff]  ;;  %v636_v59 = vpack.c.bf16 %v80_v51, %v72_v50  ;;  %v71_v61 = vld [vmem:[#allocation5 + $0xb0] sm:$0xff]  ;;  %v88_v63 = vld [vmem:[#allocation5 + $0x138] sm:$0xff]  ;;  %v606_v2 = vpack.c.bf16 %v77_v57, %v69_v56 }
  0x44   :  { %v94_v60 = vld [vmem:[#allocation5 + $0x168] sm:$0xff]  ;;  %v79_v62 = vld [vmem:[#allocation5 + $0xf0] sm:$0xff]  ;;  %v96_v0 = vld [vmem:[#allocation5 + $0x178] sm:$0xff] }
  0x45   :  { %563 = vmatpush1.bf16.msra.mxu0 %v562_v28  ;;  %v608_v3 = vpack.c.bf16 %v94_v60, %v86_v58  ;;  %v638_v4 = vpack.c.bf16 %v79_v62, %v71_v61  ;;  %v85_v5 = vld [vmem:[#allocation5 + $0x120] sm:$0xff]  ;;  %v102_v7 = vld [vmem:[#allocation5 + $0x1a8] sm:$0xff]  ;;  %v640_v8 = vpack.c.bf16 %v96_v0, %v88_v63  ;;  %v87_v10 = vld [vmem:[#allocation5 + $0x130] sm:$0xff] }
  0x46   :  { %595 = vmatpush1.bf16.msra.mxu1 %v594_v29  ;;  %565 = vmatprep.subr.bf16.mxu0 %v564_v30  ;;  %v93_v6 = vld [vmem:[#allocation5 + $0x160] sm:$0xff]  ;;  %v110_v9 = vld [vmem:[#allocation5 + $0x1e8] sm:$0xff]  ;;  %v95_v11 = vld [vmem:[#allocation5 + $0x170] sm:$0xff] }
  0x47   :  { %597 = vmatprep.subr.bf16.mxu1 %v596_v34  ;;  %v104_v12 = vld [vmem:[#allocation5 + $0x1b8] sm:$0xff]  ;;  %v610_v14 = vpack.c.bf16 %v93_v6, %v85_v5  ;;  %v612_v15 = vpack.c.bf16 %v110_v9, %v102_v7  ;;  %v642_v16 = vpack.c.bf16 %v95_v11, %v87_v10  ;;  %v101_v17 = vld [vmem:[#allocation5 + $0x1a0] sm:$0xff]  ;;  %v118_v19 = vld [vmem:[#allocation5 + $0x228] sm:$0xff] }
  0x48   :  { %v112_v13 = vld [vmem:[#allocation5 + $0x1f8] sm:$0xff]  ;;  %v109_v18 = vld [vmem:[#allocation5 + $0x1e0] sm:$0xff]  ;;  %v126_v21 = vld [vmem:[#allocation5 + $0x268] sm:$0xff] }
  0x49   :  { %567 = vmatpush1.bf16.msra.mxu0 %v566_v40  ;;  %v644_v20 = vpack.c.bf16 %v112_v13, %v104_v12  ;;  %v103_v22 = vld [vmem:[#allocation5 + $0x1b0] sm:$0xff]  ;;  %v120_v24 = vld [vmem:[#allocation5 + $0x238] sm:$0xff]  ;;  %v614_v26 = vpack.c.bf16 %v109_v18, %v101_v17  ;;  %v117_v28 = vld [vmem:[#allocation5 + $0x220] sm:$0xff] }
  0x4a   :  { %599 = vmatpush1.bf16.msra.mxu1 %v598_v41  ;;  %601 = vmatprep.subr.bf16.mxu0 %v600_v42  ;;  %v111_v23 = vld [vmem:[#allocation5 + $0x1f0] sm:$0xff]  ;;  %v128_v25 = vld [vmem:[#allocation5 + $0x278] sm:$0xff]  ;;  %v125_v29 = vld [vmem:[#allocation5 + $0x260] sm:$0xff] }
  0x4b   :  { %633 = vmatprep.subr.bf16.mxu1 %v632_v46  ;;  %v646_v27 = vpack.c.bf16 %v111_v23, %v103_v22  ;;  %v134_v30 = vld [vmem:[#allocation5 + $0x2a8] sm:$0xff]  ;;  %v648_v31 = vpack.c.bf16 %v128_v25, %v120_v24  ;;  %v119_v33 = vld [vmem:[#allocation5 + $0x230] sm:$0xff]  ;;  %v136_v35 = vld [vmem:[#allocation5 + $0x2b8] sm:$0xff]  ;;  %v618_v37 = vpack.c.bf16 %v125_v29, %v117_v28 }
  0x4c   :  { %242 = vmatmul.mubr.f32.vlgmr.msra.gmra.mrb[0].mxu0 %v769_v52  ;;  %v142_v32 = vld [vmem:[#allocation5 + $0x2e8] sm:$0xff]  ;;  %v127_v34 = vld [vmem:[#allocation5 + $0x270] sm:$0xff]  ;;  %v144_v36 = vld [vmem:[#allocation5 + $0x2f8] sm:$0xff] }
  0x4d   :  { %313 = vmatmul.mubr.f32.vlgmr.msra.gmra.mrb[0].mxu1 %v769_v52  ;;  %603 = vmatpush1.bf16.msra.mxu0 %v602_v53  ;;  %v620_v38 = vpack.c.bf16 %v142_v32, %v134_v30  ;;  %v650_v39 = vpack.c.bf16 %v127_v34, %v119_v33  ;;  %v133_v40 = vld [vmem:[#allocation5 + $0x2a0] sm:$0xff]  ;;  %v150_v42 = vld [vmem:[#allocation5 + $0x328] sm:$0xff]  ;;  %v652_v43 = vpack.c.bf16 %v144_v36, %v136_v35  ;;  %v135_v45 = vld [vmem:[#allocation5 + $0x2b0] sm:$0xff] }
  0x4e   :  { %605 = vmatprep.subr.bf16.mxu0 %v604_v54  ;;  %635 = vmatpush1.bf16.msra.mxu1 %v634_v55  ;;  %v141_v41 = vld [vmem:[#allocation5 + $0x2e0] sm:$0xff]  ;;  %v158_v44 = vld [vmem:[#allocation5 + $0x368] sm:$0xff]  ;;  %v143_v46 = vld [vmem:[#allocation5 + $0x2f0] sm:$0xff] }
  0x4f   :  { %637 = vmatprep.subr.bf16.mxu1 %v636_v59  ;;  %383 = vmatprep.mubr.f32.mxu0 %v725_v1  ;;  %v152_v47 = vld [vmem:[#allocation5 + $0x338] sm:$0xff]  ;;  %v622_v49 = vpack.c.bf16 %v141_v41, %v133_v40  ;;  %v624_v50 = vpack.c.bf16 %v158_v44, %v150_v42  ;;  %v654_v51 = vpack.c.bf16 %v143_v46, %v135_v45  ;;  %v149_v53 = vld [vmem:[#allocation5 + $0x320] sm:$0xff]  ;;  %v166_v55 = vld [vmem:[#allocation5 + $0x3a8] sm:$0xff] }
  0x50   :  { %454 = vmatprep.mubr.f32.mxu1 %v725_v1  ;;  %v616_v1 = vpack.c.bf16 %v126_v21, %v118_v19  ;;  %v160_v48 = vld [vmem:[#allocation5 + $0x378] sm:$0xff]  ;;  %v157_v54 = vld [vmem:[#allocation5 + $0x360] sm:$0xff]  ;;  %v174_v57 = vld [vmem:[#allocation5 + $0x3e8] sm:$0xff] }
  0x51   :  { %607 = vmatpush1.bf16.msra.mxu0 %v606_v2  ;;  %v656_v56 = vpack.c.bf16 %v160_v48, %v152_v47  ;;  %v151_v58 = vld [vmem:[#allocation5 + $0x330] sm:$0xff]  ;;  %v168_v60 = vld [vmem:[#allocation5 + $0x3b8] sm:$0xff]  ;;  %v626_v62 = vpack.c.bf16 %v157_v54, %v149_v53  ;;  %v628_v63 = vpack.c.bf16 %v174_v57, %v166_v55  ;;  %v165_v2 = vld [vmem:[#allocation5 + $0x3a0] sm:$0xff] }
  0x52   :  { %609 = vmatprep.subr.bf16.mxu0 %v608_v3  ;;  %639 = vmatpush1.bf16.msra.mxu1 %v638_v4  ;;  %v159_v59 = vld [vmem:[#allocation5 + $0x370] sm:$0xff]  ;;  %v176_v61 = vld [vmem:[#allocation5 + $0x3f8] sm:$0xff]  ;;  %v173_v3 = vld [vmem:[#allocation5 + $0x3e0] sm:$0xff] }
  0x53   :  { %641 = vmatprep.subr.bf16.mxu1 %v640_v8  ;;  %v658_v0 = vpack.c.bf16 %v159_v59, %v151_v58  ;;  %v660_v4 = vpack.c.bf16 %v176_v61, %v168_v60  ;;  %v167_v5 = vld [vmem:[#allocation5 + $0x3b0] sm:$0xff]  ;;  %v630_v7 = vpack.c.bf16 %v173_v3, %v165_v2 }
  0x54   :  { %v175_v6 = vld [vmem:[#allocation5 + $0x3f0] sm:$0xff] }
  0x55   :  { %611 = vmatpush1.bf16.msra.mxu0 %v610_v14  ;;  %v662_v8 = vpack.c.bf16 %v175_v6, %v167_v5 }
  0x56   :  { %613 = vmatprep.subr.bf16.mxu0 %v612_v15  ;;  %643 = vmatpush1.bf16.msra.mxu1 %v642_v16 }
  0x57   :  { %645 = vmatprep.subr.bf16.mxu1 %v644_v20 }
  0x59   :  { %615 = vmatpush1.bf16.msra.mxu0 %v614_v26 }
  0x5a   :  { %617 = vmatprep.subr.bf16.mxu0 %v616_v1  ;;  %647 = vmatpush1.bf16.msra.mxu1 %v646_v27 }
  0x5b   :  { %649 = vmatprep.subr.bf16.mxu1 %v648_v31 }
  0x5d   :  { %619 = vmatpush1.bf16.msra.mxu0 %v618_v37 }
  0x5e   :  { %621 = vmatprep.subr.bf16.mxu0 %v620_v38  ;;  %651 = vmatpush1.bf16.msra.mxu1 %v650_v39 }
  0x5f   :  { %653 = vmatprep.subr.bf16.mxu1 %v652_v43 }
  0x61   :  { %623 = vmatpush1.bf16.msra.mxu0 %v622_v49 }
  0x62   :  { %625 = vmatprep.subr.bf16.mxu0 %v624_v50  ;;  %655 = vmatpush1.bf16.msra.mxu1 %v654_v51 }
  0x63   :  { %657 = vmatprep.subr.bf16.mxu1 %v656_v56 }
  0x65   :  { %627 = vmatpush1.bf16.msra.mxu0 %v626_v62 }
  0x66   :  { %629 = vmatprep.subr.bf16.mxu0 %v628_v63  ;;  %659 = vmatpush1.bf16.msra.mxu1 %v658_v0 }
  0x67   :  { %661 = vmatprep.subr.bf16.mxu1 %v660_v4 }
  0x69   :  { %631 = vmatpush1.bf16.msra.mxu0 %v630_v7 }
  0x6a   :  { %663 = vmatpush1.bf16.msra.mxu1 %v662_v8 }
  0x6c   :  { %384 = vmatmul.mubr.f32.vlgmr.msra.gmra.mrb[2].mxu0 %v769_v52 }
  0x6d   :  { %455 = vmatmul.mubr.f32.vlgmr.msra.gmra.mrb[2].mxu1 %v769_v52 }
 0x11f   :  { %v243_v9 = vpop.f32.mrb[0].mxu0 }
 0x120   :  { %v245_v10 = vpop.f32.mrb[1].mxu0  ;;  %v314_v11 = vpop.f32.mrb[0].mxu1  ;;  %v461_v12 = vmul.f32 %v243_v9, %v769_v52 }
 0x121   :  { %v468_v13 = vmul.f32 %v314_v11, %v769_v52  ;;  %v316_v14 = vpop.f32.mrb[1].mxu1  ;;  %v464_v16 = vmul.f32 %v245_v10, %v769_v52 }
 0x122   :  { %462 = vadd.xlane.f32.xlu0 %v461_v12  ;;  %v472_v15 = vmul.f32 %v316_v14, %v769_v52 }
 0x123   :  { %469 = vadd.xlane.f32.xlu1 %v468_v13 }
 0x126   :  { %465 = vadd.xlane.f32.xlu0 %v464_v16 }
 0x127   :  { %473 = vadd.xlane.f32.xlu1 %v472_v15 }
 0x13f   :  { %v385_v17 = vpop.f32.mrb[2].mxu0 }
 0x140   :  { %v476_v18 = vmul.f32 %v385_v17, %v769_v52  ;;  %v387_v19 = vpop.f32.mrb[3].mxu0  ;;  %v456_v20 = vpop.f32.mrb[2].mxu1 }
 0x141   :  { %v480_v21 = vmul.f32 %v387_v19, %v769_v52  ;;  %v458_v22 = vpop.f32.mrb[3].mxu1  ;;  %v484_v23 = vmul.f32 %v456_v20, %v769_v52 }
 0x142   :  { %477 = vadd.xlane.f32.xlu0 %v476_v18  ;;  %v488_v24 = vmul.f32 %v458_v22, %v769_v52 }
 0x143   :  { %481 = vadd.xlane.f32.xlu1 %v480_v21 }
 0x146   :  { %485 = vadd.xlane.f32.xlu0 %v484_v23 }
 0x147   :  { %489 = vadd.xlane.f32.xlu1 %v488_v24 }
 0x1af   :  { %v463_v25 = vpop.xlane.xlu0 %462 }
 0x1b0   :  { %v470_v1 = vpop.xlane.xlu1 %469 }
 0x1b3   :  { %v466_v26 = vpop.xlane.xlu0 %465 }
 0x1b4   :  { %v467_v27 = vmin.f32 %v463_v25, %v466_v26  ;;  %v474_v29 = vpop.xlane.xlu1 %473 }
 0x1b6   :  { %v471_v28 = vmin.f32 %v467_v27, %v470_v1 }
 0x1b8   :  { %v475_v30 = vmin.f32 %v471_v28, %v474_v29 }
 0x1cf   :  { %v478_v31 = vpop.xlane.xlu0 %477 }
 0x1d0   :  { %v479_v32 = vmin.f32 %v475_v30, %v478_v31  ;;  %v482_v33 = vpop.xlane.xlu1 %481 }
 0x1d2   :  { %v483_v34 = vmin.f32 %v479_v32, %v482_v33 }
 0x1d3   :  { %v486_v35 = vpop.xlane.xlu0 %485 }
 0x1d4   :  { %v487_v36 = vmin.f32 %v483_v34, %v486_v35  ;;  %v490_v37 = vpop.xlane.xlu1 %489 }
 0x1d6   :  { %v491_v38 = vmin.f32 %v487_v36, %v490_v37 }
 0x1d8   :  { %493 = vst.msk [vmem:[#allocation7] sm:$0xff] %vm492_vm2, %v491_v38 }
 0x1df   :  { %v511_v52 = vld [vmem:[#allocation7] sm:$0x3] }
 0x1e0   :  { %512 = vst [vmem:[%s790_s2] sm:$0x3] %v511_v52 }
 0x1e1   :  { %529 = vsyncpa [#allocation4], 1 }
 0x1e2   :  { %530 = vsyncpa [#allocation6], 1 }

</bundles_post_ra>
